<compile_context>
chip_gen: v5e
topology: v5e:2x2
jax: 0.10.0
libtpu: 0.0.40
codegen_flags: <defaults>
</compile_context>

<pallas_src>
import numpy as np
import jax
import jax.numpy as jnp
from jax import lax
from jax.experimental import pallas as pl
from jax.experimental.pallas import tpu as pltpu

_HIGHEST = jax.lax.Precision.HIGHEST


def _conv3x3_rows(xv, m0, m1, m2, bias, H):
    """One 3x3 'same' conv (+bias, +ReLU) on a (M, W*Ci) slab, M = bblk*H.

    kw shift, W-boundary zero padding and Ci->Co mixing are folded into the
    banded matrices m0/m1/m2 (one per kh tap).  The kh shift is done on the
    input via pltpu.roll plus a one-row boundary mask per image, and the three
    tap matmuls + bias are accumulated in a single f32 expression.
    """
    M = xv.shape[0]
    row = lax.broadcasted_iota(jnp.int32, xv.shape, 0) % H
    x_up = jnp.where(row == 0, 0.0, pltpu.roll(xv, 1, axis=0))                # row r <- x[r-1]
    x_dn = jnp.where(row == H - 1, 0.0, pltpu.roll(xv, (M - 1) % M, axis=0))  # row r <- x[r+1]
    acc = (jnp.dot(x_up, m0, preferred_element_type=jnp.float32)
           + jnp.dot(xv, m1, preferred_element_type=jnp.float32)
           + jnp.dot(x_dn, m2, preferred_element_type=jnp.float32)
           + bias)
    return jnp.maximum(acc, 0.0)


def _make_kernel(H, cout, pack, half):
    """Kernel closure over static config (H, Cout, row-packing factor)."""

    def kernel(x_ref, m1_ref, b1_ref, m2_ref, b2_ref, sd_ref, rs_ref,
               pooled_ref, bp_ref):
        # x_ref:      (1, bblk*H, W*Cin)
        # m1_ref:     (3, W*Cin,  W*Cout)    banded conv1 matrices (per kh tap)
        # b1_ref:     (1, W*Cout)
        # m2_ref:     (3, W*Cout, W*Cout)    banded conv2 matrices
        # b2_ref:     (1, W*Cout)
        # sd_ref:     (W*Cout, pack*half)    pool column compaction (duplicated
        #                                    into `pack` lane blocks)
        # rs_ref:     (bblk*H//(2*pack), bblk*H)  packed-row selector
        # pooled_ref: (1, bblk*H//(2*pack), pack*half)
        # bp_ref:     (1, bblk*H, W*Cout)    "before_pool" output
        f32 = jnp.float32
        xv = x_ref[0].astype(f32)                                   # (M, W*Cin)
        b1 = b1_ref[...]
        b2 = b2_ref[...]

        h1 = _conv3x3_rows(xv, m1_ref[0], m1_ref[1], m1_ref[2], b1, H)
        h2 = _conv3x3_rows(h1, m2_ref[0], m2_ref[1], m2_ref[2], b2, H)
        bp_ref[0] = h2.astype(bp_ref.dtype)                         # (M, W*Cout)

        # 2x2 / stride-2 max-pool:
        #   pooled value for (image b, row i, col j, ch c) ends up at slab row
        #   b*H + 2i, column (2j)*Cout + c after the two roll+max steps.
        M, wco = h2.shape
        am = jnp.maximum(h2, pltpu.roll(h2, (M - 1) % M, axis=0))          # rows 2i | 2i+1
        am = jnp.maximum(am, pltpu.roll(am, (wco - cout) % wco, axis=1))   # cols 2j | 2j+1

        # Column compaction (lane gather) via selection matmul at HIGHEST
        # precision so pooled bits match before_pool.
        amd = jnp.dot(am, sd_ref[...], precision=_HIGHEST,
                      preferred_element_type=f32)                   # (M, pack*half)
        if pack == 2:
            # Pack pooled row p (lanes [0,half)) and pooled row p+1 (lanes
            # [half, 2*half)) of the same image into one 128-lane row.
            lane = lax.broadcasted_iota(jnp.int32, amd.shape, 1)
            amd = jnp.where(lane < half, amd,
                            pltpu.roll(amd, (M - 2) % M, axis=0))
        pooled = jnp.dot(rs_ref[...], amd, precision=_HIGHEST,
                         preferred_element_type=f32)                # (M//(2*pack), pack*half)
        pooled_ref[0] = pooled.astype(pooled_ref.dtype)

    return kernel


def _banded_weights(w_hwio, W):
    """HWIO (3,3,Ci,Co) conv weights -> (3, W*Ci, W*Co) banded matrices.

    M[kh, (w+kw-1)*Ci + ci, w*Co + co] = w[kh, kw, ci, co]  (only valid w+kw-1),
    so the kh-tap contribution to output row r is  x_rows[r+kh-1] @ M[kh].
    The W boundary ("same" padding along W) is handled by omitting
    out-of-range entries.
    """
    _, _, ci_n, co_n = w_hwio.shape
    t = np.zeros((3, W * ci_n, W, ci_n), np.float32)
    for kw in range(3):
        for w in range(W):
            wi = w + kw - 1
            if 0 <= wi < W:
                for ci in range(ci_n):
                    t[kw, wi * ci_n + ci, w, ci] = 1.0
    m = jnp.einsum('kpwi,hkio->hpwo', jnp.asarray(t), w_hwio.astype(jnp.float32))
    return m.reshape(3, W * ci_n, W * co_n)


def _pool_selectors(H, W, co_n, bblk, pack):
    """Column-compaction selector + packed-row selector for the 2x2 pool.

    After roll+max, the pooled value for output (i, j, c) of image b lives at
    row b*H + 2*i, column (2*j)*co_n + c of the (bblk*H, W*co_n) slab.  `sdup`
    compacts the columns (duplicated into `pack` lane blocks); `rsel` gathers
    `pack` consecutive pooled rows of one image into one lane-dense row.
    """
    half = (W // 2) * co_n
    hp = H // 2
    M = bblk * H
    s = np.zeros((W * co_n, pack * half), np.float32)
    for j in range(W // 2):
        for c in range(co_n):
            for p in range(pack):
                s[(2 * j) * co_n + c, p * half + j * co_n + c] = 1.0
    nk = M // (2 * pack)
    r = np.zeros((nk, M), np.float32)
    for k in range(nk):
        p0 = pack * k                      # first flat pooled row in packed row k
        bi, i0 = divmod(p0, hp)
        r[k, bi * H + 2 * i0] = 1.0
    return jnp.asarray(s), jnp.asarray(r)


def down_conv(x_nchw, w1, b1, w2, b2, *, pooling=True):
    """Matches DownConv.forward: returns (x, before_pool), both NCHW."""
    B, Cin, H, W = x_nchw.shape
    Cout = w1.shape[-1]
    assert H % 2 == 0 and W % 2 == 0, "2x2/stride-2 pool requires even H and W"

    half = (W // 2) * Cout
    # Pack two pooled rows per output row when that makes the pooled store
    # lane-dense and H allows it (H % 4 == 0 keeps row pairs inside one image).
    pack = 2 if (half % 128 != 0 and H % 4 == 0) else 1

    # Grid: fold bblk images into the matmul M dimension per step; keep >= 2
    # steps when B >= 2 (megacore on v7x, pipeline depth everywhere).
    bblk = max(1, min(B, max(1, 32 // H)))
    if B >= 2:
        bblk = min(bblk, (B + 1) // 2)
    nsteps = -(-B // bblk)
    Bp = nsteps * bblk

    # Lane-dense activation layout: (nsteps, bblk*H, W*C).
    x = jnp.transpose(x_nchw, (0, 2, 3, 1)).astype(jnp.float32).reshape(B, H, W * Cin)
    if Bp != B:
        x = jnp.pad(x, ((0, Bp - B), (0, 0), (0, 0)))
    x = x.reshape(nsteps, bblk * H, W * Cin)

    m1 = _banded_weights(w1, W)                                   # (3, W*Cin,  W*Cout)
    m2 = _banded_weights(w2, W)                                   # (3, W*Cout, W*Cout)
    b1w = jnp.tile(b1.astype(jnp.float32), (W,)).reshape(1, W * Cout)
    b2w = jnp.tile(b2.astype(jnp.float32), (W,)).reshape(1, W * Cout)
    sdup, rsel = _pool_selectors(H, W, Cout, bblk, pack)

    RB = bblk * H
    NK = RB // (2 * pack)
    kernel = _make_kernel(H, Cout, pack, half)

    grid_spec = pltpu.PrefetchScalarGridSpec(
        num_scalar_prefetch=0,
        grid=(nsteps,),
        in_specs=[
            pl.BlockSpec((1, RB, W * Cin), lambda b: (b, 0, 0)),
            pl.BlockSpec((3, W * Cin, W * Cout), lambda b: (0, 0, 0)),
            pl.BlockSpec((1, W * Cout), lambda b: (0, 0)),
            pl.BlockSpec((3, W * Cout, W * Cout), lambda b: (0, 0, 0)),
            pl.BlockSpec((1, W * Cout), lambda b: (0, 0)),
            pl.BlockSpec((W * Cout, pack * half), lambda b: (0, 0)),
            pl.BlockSpec((NK, RB), lambda b: (0, 0)),
        ],
        out_specs=[
            pl.BlockSpec((1, NK, pack * half), lambda b: (b, 0, 0)),
            pl.BlockSpec((1, RB, W * Cout), lambda b: (b, 0, 0)),
        ],
    )
    pooled, before_pool = pl.pallas_call(
        kernel,
        out_shape=(jax.ShapeDtypeStruct((nsteps, NK, pack * half), jnp.float32),
                   jax.ShapeDtypeStruct((nsteps, RB, W * Cout), jnp.float32)),
        grid_spec=grid_spec,
        compiler_params=pltpu.CompilerParams(dimension_semantics=("parallel",)),
    )(x, m1, b1w, m2, b2w, sdup, rsel)

    # Wrapper-side layout plumbing back to NCHW (pure layout; skip these
    # transposes if the surrounding model can consume NHWC / (H, W*C) slabs).
    before_pool = before_pool.reshape(Bp, H, W, Cout)[:B]
    pooled = pooled.reshape(Bp, H // 2, W // 2, Cout)[:B]
    before_pool_nchw = jnp.transpose(before_pool, (0, 3, 1, 2))
    x_out = jnp.transpose(pooled, (0, 3, 1, 2)) if pooling else before_pool_nchw
    return x_out, before_pool_nchw


def init_params(key, in_ch, out_ch):
    """Deterministic Conv2d-style (kaiming-uniform) init; weights in HWIO."""
    k1, k2, k3, k4 = jax.random.split(key, 4)
    bound1 = 1.0 / np.sqrt(in_ch * 9)
    w1 = jax.random.uniform(k1, (3, 3, in_ch, out_ch), jnp.float32, -bound1, bound1)
    b1 = jax.random.uniform(k2, (out_ch,), jnp.float32, -bound1, bound1)
    bound2 = 1.0 / np.sqrt(out_ch * 9)
    w2 = jax.random.uniform(k3, (3, 3, out_ch, out_ch), jnp.float32, -bound2, bound2)
    b2 = jax.random.uniform(k4, (out_ch,), jnp.float32, -bound2, bound2)
    return w1, b1, w2, b2


def ref_downconv(x_nchw, w1, b1, w2, b2):
    """Pure-JAX reference (XLA conv + reduce_window) for correctness check."""
    dn = ('NHWC', 'HWIO', 'NHWC')
    x = jnp.transpose(x_nchw, (0, 2, 3, 1)).astype(jnp.float32)
    h1 = jax.nn.relu(lax.conv_general_dilated(x, w1, (1, 1), 'SAME',
                                              dimension_numbers=dn) + b1)
    h2 = jax.nn.relu(lax.conv_general_dilated(h1, w2, (1, 1), 'SAME',
                                              dimension_numbers=dn) + b2)
    p = lax.reduce_window(h2, -jnp.inf, lax.max, (1, 2, 2, 1), (1, 2, 2, 1), 'VALID')
    return jnp.transpose(p, (0, 3, 1, 2)), jnp.transpose(h2, (0, 3, 1, 2))


if __name__ == "__main__":
    B, Cin, Cout, H, W = 2, 4, 8, 16, 16
    key = jax.random.PRNGKey(0)
    kx, kp = jax.random.split(key)
    x = jax.random.normal(kx, (B, Cin, H, W), jnp.float32)            # NCHW input
    w1, b1, w2, b2 = init_params(kp, Cin, Cout)

    pooled, before_pool = down_conv(x, w1, b1, w2, b2, pooling=True)
    pooled = jax.block_until_ready(pooled)
    before_pool = jax.block_until_ready(before_pool)

    assert pooled.shape == (B, Cout, H // 2, W // 2)
    assert before_pool.shape == (B, Cout, H, W)

    ref_p, ref_bp = ref_downconv(x, w1, b1, w2, b2)
    np.testing.assert_allclose(np.asarray(before_pool), np.asarray(ref_bp),
                               rtol=1e-4, atol=1e-4)
    np.testing.assert_allclose(np.asarray(pooled), np.asarray(ref_p),
                               rtol=1e-4, atol=1e-4)
    print("KERNEL_OK")
</pallas_src>

<mosaic_0001>
module attributes {stable_mosaic.version = 11 : i64} {
  func.func @kernel(%arg0: i32, %arg1: memref<1x16x64xf32, #tpu.memory_space<vmem>>, %arg2: memref<3x64x128xf32, #tpu.memory_space<vmem>>, %arg3: memref<1x128xf32, #tpu.memory_space<vmem>>, %arg4: memref<3x128x128xf32, #tpu.memory_space<vmem>>, %arg5: memref<1x128xf32, #tpu.memory_space<vmem>>, %arg6: memref<128x128xf32, #tpu.memory_space<vmem>>, %arg7: memref<4x16xf32, #tpu.memory_space<vmem>>, %arg8: memref<1x4x128xf32, #tpu.memory_space<vmem>>, %arg9: memref<1x16x128xf32, #tpu.memory_space<vmem>>) attributes {dimension_semantics = [#tpu.dimension_semantics<parallel>], iteration_bounds = array<i64: 2>, scalar_prefetch = 0 : i64, scratch_operands = 0 : i64, tpu.core_type = #tpu.core_type<tc>, window_params = [{transform_indices = @transform_0, window_bounds = array<i64: 1, 16, 64>}, {pipeline_mode = #tpu.pipeline_mode<synchronous>, transform_indices = @transform_1, window_bounds = array<i64: 3, 64, 128>}, {pipeline_mode = #tpu.pipeline_mode<synchronous>, transform_indices = @transform_2, window_bounds = array<i64: 1, 128>}, {pipeline_mode = #tpu.pipeline_mode<synchronous>, transform_indices = @transform_3, window_bounds = array<i64: 3, 128, 128>}, {pipeline_mode = #tpu.pipeline_mode<synchronous>, transform_indices = @transform_4, window_bounds = array<i64: 1, 128>}, {pipeline_mode = #tpu.pipeline_mode<synchronous>, transform_indices = @transform_5, window_bounds = array<i64: 128, 128>}, {pipeline_mode = #tpu.pipeline_mode<synchronous>, transform_indices = @transform_6, window_bounds = array<i64: 4, 16>}, {transform_indices = @transform_7, window_bounds = array<i64: 1, 4, 128>}, {transform_indices = @transform_8, window_bounds = array<i64: 1, 16, 128>}]} {
    %c0 = arith.constant 0 : index
    %c0_0 = arith.constant 0 : index
    %c0_1 = arith.constant 0 : index
    %0 = vector.load %arg1[%c0, %c0_0, %c0_1] : memref<1x16x64xf32, #tpu.memory_space<vmem>>, vector<1x16x64xf32>
    %1 = vector.shape_cast %0 : vector<1x16x64xf32> to vector<16x64xf32>
    %c0_2 = arith.constant 0 : index
    %c0_3 = arith.constant 0 : index
    %2 = vector.load %arg3[%c0_2, %c0_3] : memref<1x128xf32, #tpu.memory_space<vmem>>, vector<1x128xf32>
    %c0_4 = arith.constant 0 : index
    %c0_5 = arith.constant 0 : index
    %3 = vector.load %arg5[%c0_4, %c0_5] : memref<1x128xf32, #tpu.memory_space<vmem>>, vector<1x128xf32>
    %c0_6 = arith.constant 0 : index
    %c0_7 = arith.constant 0 : index
    %c0_8 = arith.constant 0 : index
    %4 = vector.load %arg2[%c0_6, %c0_7, %c0_8] : memref<3x64x128xf32, #tpu.memory_space<vmem>>, vector<1x64x128xf32>
    %5 = vector.shape_cast %4 : vector<1x64x128xf32> to vector<64x128xf32>
    %c1 = arith.constant 1 : index
    %c0_9 = arith.constant 0 : index
    %c0_10 = arith.constant 0 : index
    %6 = vector.load %arg2[%c1, %c0_9, %c0_10] : memref<3x64x128xf32, #tpu.memory_space<vmem>>, vector<1x64x128xf32>
    %7 = vector.shape_cast %6 : vector<1x64x128xf32> to vector<64x128xf32>
    %c2 = arith.constant 2 : index
    %c0_11 = arith.constant 0 : index
    %c0_12 = arith.constant 0 : index
    %8 = vector.load %arg2[%c2, %c0_11, %c0_12] : memref<3x64x128xf32, #tpu.memory_space<vmem>>, vector<1x64x128xf32>
    %9 = vector.shape_cast %8 : vector<1x64x128xf32> to vector<64x128xf32>
    %10 = tpu.iota {dimensions = array<i32: 0>} : vector<16x64xi32>
    %c16_i32 = arith.constant 16 : i32
    %c0_i32 = arith.constant 0 : i32
    %11 = arith.cmpi eq, %c16_i32, %c0_i32 : i32
    %c1_i32 = arith.constant 1 : i32
    %12 = arith.select %11, %c1_i32, %c16_i32 : i32
    %13 = vector.broadcast %12 : i32 to vector<16x64xi32>
    %14 = arith.remsi %10, %13 : vector<16x64xi32>
    %c0_i32_13 = arith.constant 0 : i32
    %15 = vector.broadcast %c0_i32_13 : i32 to vector<16x64xi32>
    %16 = arith.cmpi ne, %14, %15 : vector<16x64xi32>
    %c0_i32_14 = arith.constant 0 : i32
    %17 = vector.broadcast %c0_i32_14 : i32 to vector<16x64xi32>
    %18 = arith.cmpi slt, %14, %17 : vector<16x64xi32>
    %c0_i32_15 = arith.constant 0 : i32
    %19 = arith.cmpi slt, %12, %c0_i32_15 : i32
    %20 = vector.broadcast %19 : i1 to vector<16x64xi1>
    %21 = vector.broadcast %20 : vector<16x64xi1> to vector<16x64xi1>
    %22 = arith.xori %18, %21 : vector<16x64xi1>
    %23 = arith.andi %22, %16 : vector<16x64xi1>
    %24 = vector.broadcast %12 : i32 to vector<16x64xi32>
    %25 = arith.addi %14, %24 : vector<16x64xi32>
    %26 = arith.select %23, %25, %14 : vector<16x64xi1>, vector<16x64xi32>
    %c0_i32_16 = arith.constant 0 : i32
    %27 = vector.broadcast %c0_i32_16 : i32 to vector<16x64xi32>
    %28 = arith.cmpi eq, %26, %27 : vector<16x64xi32>
    %c1_i32_17 = arith.constant 1 : i32
    %29 = tpu.dynamic_rotate %1 by %c1_i32_17 dim 0 : vector<16x64xf32>, i32 -> vector<16x64xf32>
    %cst = arith.constant 0.000000e+00 : f32
    %30 = vector.broadcast %cst : f32 to vector<16x64xf32>
    %31 = arith.select %28, %30, %29 : vector<16x64xi1>, vector<16x64xf32>
    %c15_i32 = arith.constant 15 : i32
    %32 = vector.broadcast %c15_i32 : i32 to vector<16x64xi32>
    %33 = arith.cmpi eq, %26, %32 : vector<16x64xi32>
    %c15_i32_18 = arith.constant 15 : i32
    %34 = tpu.dynamic_rotate %1 by %c15_i32_18 dim 0 : vector<16x64xf32>, i32 -> vector<16x64xf32>
    %cst_19 = arith.constant 0.000000e+00 : f32
    %35 = vector.broadcast %cst_19 : f32 to vector<16x64xf32>
    %36 = arith.select %33, %35, %34 : vector<16x64xi1>, vector<16x64xf32>
    %cst_20 = arith.constant dense<0.000000e+00> : vector<16x128xf32>
    %37 = tpu.matmul %31, %5, %cst_20 {dimension_numbers = #tpu.dot_dimension_numbers<[1], [0], [0], [1], [0, 0, 1, 1], [], []>} : vector<16x64xf32>, vector<64x128xf32>, vector<16x128xf32> -> vector<16x128xf32>
    %cst_21 = arith.constant dense<0.000000e+00> : vector<16x128xf32>
    %38 = tpu.matmul %1, %7, %cst_21 {dimension_numbers = #tpu.dot_dimension_numbers<[1], [0], [0], [1], [0, 0, 1, 1], [], []>} : vector<16x64xf32>, vector<64x128xf32>, vector<16x128xf32> -> vector<16x128xf32>
    %39 = arith.addf %37, %38 : vector<16x128xf32>
    %cst_22 = arith.constant dense<0.000000e+00> : vector<16x128xf32>
    %40 = tpu.matmul %36, %9, %cst_22 {dimension_numbers = #tpu.dot_dimension_numbers<[1], [0], [0], [1], [0, 0, 1, 1], [], []>} : vector<16x64xf32>, vector<64x128xf32>, vector<16x128xf32> -> vector<16x128xf32>
    %41 = arith.addf %39, %40 : vector<16x128xf32>
    %42 = vector.broadcast %2 : vector<1x128xf32> to vector<16x128xf32>
    %43 = arith.addf %41, %42 : vector<16x128xf32>
    %cst_23 = arith.constant 0.000000e+00 : f32
    %44 = vector.broadcast %cst_23 : f32 to vector<16x128xf32>
    %45 = arith.maximumf %43, %44 : vector<16x128xf32>
    %c0_24 = arith.constant 0 : index
    %c0_25 = arith.constant 0 : index
    %c0_26 = arith.constant 0 : index
    %46 = vector.load %arg4[%c0_24, %c0_25, %c0_26] : memref<3x128x128xf32, #tpu.memory_space<vmem>>, vector<1x128x128xf32>
    %47 = vector.shape_cast %46 : vector<1x128x128xf32> to vector<128x128xf32>
    %c1_27 = arith.constant 1 : index
    %c0_28 = arith.constant 0 : index
    %c0_29 = arith.constant 0 : index
    %48 = vector.load %arg4[%c1_27, %c0_28, %c0_29] : memref<3x128x128xf32, #tpu.memory_space<vmem>>, vector<1x128x128xf32>
    %49 = vector.shape_cast %48 : vector<1x128x128xf32> to vector<128x128xf32>
    %c2_30 = arith.constant 2 : index
    %c0_31 = arith.constant 0 : index
    %c0_32 = arith.constant 0 : index
    %50 = vector.load %arg4[%c2_30, %c0_31, %c0_32] : memref<3x128x128xf32, #tpu.memory_space<vmem>>, vector<1x128x128xf32>
    %51 = vector.shape_cast %50 : vector<1x128x128xf32> to vector<128x128xf32>
    %52 = tpu.iota {dimensions = array<i32: 0>} : vector<16x128xi32>
    %c16_i32_33 = arith.constant 16 : i32
    %c0_i32_34 = arith.constant 0 : i32
    %53 = arith.cmpi eq, %c16_i32_33, %c0_i32_34 : i32
    %c1_i32_35 = arith.constant 1 : i32
    %54 = arith.select %53, %c1_i32_35, %c16_i32_33 : i32
    %55 = vector.broadcast %54 : i32 to vector<16x128xi32>
    %56 = arith.remsi %52, %55 : vector<16x128xi32>
    %c0_i32_36 = arith.constant 0 : i32
    %57 = vector.broadcast %c0_i32_36 : i32 to vector<16x128xi32>
    %58 = arith.cmpi ne, %56, %57 : vector<16x128xi32>
    %c0_i32_37 = arith.constant 0 : i32
    %59 = vector.broadcast %c0_i32_37 : i32 to vector<16x128xi32>
    %60 = arith.cmpi slt, %56, %59 : vector<16x128xi32>
    %c0_i32_38 = arith.constant 0 : i32
    %61 = arith.cmpi slt, %54, %c0_i32_38 : i32
    %62 = vector.broadcast %61 : i1 to vector<16x128xi1>
    %63 = vector.broadcast %62 : vector<16x128xi1> to vector<16x128xi1>
    %64 = arith.xori %60, %63 : vector<16x128xi1>
    %65 = arith.andi %64, %58 : vector<16x128xi1>
    %66 = vector.broadcast %54 : i32 to vector<16x128xi32>
    %67 = arith.addi %56, %66 : vector<16x128xi32>
    %68 = arith.select %65, %67, %56 : vector<16x128xi1>, vector<16x128xi32>
    %c0_i32_39 = arith.constant 0 : i32
    %69 = vector.broadcast %c0_i32_39 : i32 to vector<16x128xi32>
    %70 = arith.cmpi eq, %68, %69 : vector<16x128xi32>
    %c1_i32_40 = arith.constant 1 : i32
    %71 = tpu.dynamic_rotate %45 by %c1_i32_40 dim 0 : vector<16x128xf32>, i32 -> vector<16x128xf32>
    %cst_41 = arith.constant 0.000000e+00 : f32
    %72 = vector.broadcast %cst_41 : f32 to vector<16x128xf32>
    %73 = arith.select %70, %72, %71 : vector<16x128xi1>, vector<16x128xf32>
    %c15_i32_42 = arith.constant 15 : i32
    %74 = vector.broadcast %c15_i32_42 : i32 to vector<16x128xi32>
    %75 = arith.cmpi eq, %68, %74 : vector<16x128xi32>
    %c15_i32_43 = arith.constant 15 : i32
    %76 = tpu.dynamic_rotate %45 by %c15_i32_43 dim 0 : vector<16x128xf32>, i32 -> vector<16x128xf32>
    %cst_44 = arith.constant 0.000000e+00 : f32
    %77 = vector.broadcast %cst_44 : f32 to vector<16x128xf32>
    %78 = arith.select %75, %77, %76 : vector<16x128xi1>, vector<16x128xf32>
    %cst_45 = arith.constant dense<0.000000e+00> : vector<16x128xf32>
    %79 = tpu.matmul %73, %47, %cst_45 {dimension_numbers = #tpu.dot_dimension_numbers<[1], [0], [0], [1], [0, 0, 1, 1], [], []>} : vector<16x128xf32>, vector<128x128xf32>, vector<16x128xf32> -> vector<16x128xf32>
    %cst_46 = arith.constant dense<0.000000e+00> : vector<16x128xf32>
    %80 = tpu.matmul %45, %49, %cst_46 {dimension_numbers = #tpu.dot_dimension_numbers<[1], [0], [0], [1], [0, 0, 1, 1], [], []>} : vector<16x128xf32>, vector<128x128xf32>, vector<16x128xf32> -> vector<16x128xf32>
    %81 = arith.addf %79, %80 : vector<16x128xf32>
    %cst_47 = arith.constant dense<0.000000e+00> : vector<16x128xf32>
    %82 = tpu.matmul %78, %51, %cst_47 {dimension_numbers = #tpu.dot_dimension_numbers<[1], [0], [0], [1], [0, 0, 1, 1], [], []>} : vector<16x128xf32>, vector<128x128xf32>, vector<16x128xf32> -> vector<16x128xf32>
    %83 = arith.addf %81, %82 : vector<16x128xf32>
    %84 = vector.broadcast %3 : vector<1x128xf32> to vector<16x128xf32>
    %85 = arith.addf %83, %84 : vector<16x128xf32>
    %cst_48 = arith.constant 0.000000e+00 : f32
    %86 = vector.broadcast %cst_48 : f32 to vector<16x128xf32>
    %87 = arith.maximumf %85, %86 : vector<16x128xf32>
    %c0_49 = arith.constant 0 : index
    %c0_50 = arith.constant 0 : index
    %c0_51 = arith.constant 0 : index
    %88 = vector.load %arg9[%c0_49, %c0_50, %c0_51] : memref<1x16x128xf32, #tpu.memory_space<vmem>>, vector<1x16x128xf32>
    %89 = vector.shape_cast %88 : vector<1x16x128xf32> to vector<16x128xf32>
    %90 = vector.shape_cast %87 : vector<16x128xf32> to vector<1x16x128xf32>
    tpu.vector_store %arg9[%c0_49, %c0_50, %c0_51], %90 {strides = array<i32>} : memref<1x16x128xf32, #tpu.memory_space<vmem>>, vector<1x16x128xf32>,
    %c15_i32_52 = arith.constant 15 : i32
    %91 = tpu.dynamic_rotate %87 by %c15_i32_52 dim 0 : vector<16x128xf32>, i32 -> vector<16x128xf32>
    %92 = arith.maximumf %87, %91 : vector<16x128xf32>
    %c120_i32 = arith.constant 120 : i32
    %93 = tpu.dynamic_rotate %92 by %c120_i32 dim 1 : vector<16x128xf32>, i32 -> vector<16x128xf32>
    %94 = arith.maximumf %92, %93 : vector<16x128xf32>
    %c0_53 = arith.constant 0 : index
    %c0_54 = arith.constant 0 : index
    %95 = vector.load %arg6[%c0_53, %c0_54] : memref<128x128xf32, #tpu.memory_space<vmem>>, vector<128x128xf32>
    %cst_55 = arith.constant dense<0.000000e+00> : vector<16x128xf32>
    %96 = tpu.matmul %94, %95, %cst_55 {dimension_numbers = #tpu.dot_dimension_numbers<[1], [0], [0], [1], [0, 0, 1, 1], [], []>, precision = #tpu.contract_precision<fp32>} : vector<16x128xf32>, vector<128x128xf32>, vector<16x128xf32> -> vector<16x128xf32>
    %97 = tpu.iota {dimensions = array<i32: 1>} : vector<16x128xi32>
    %c64_i32 = arith.constant 64 : i32
    %98 = vector.broadcast %c64_i32 : i32 to vector<16x128xi32>
    %99 = arith.cmpi slt, %97, %98 : vector<16x128xi32>
    %c14_i32 = arith.constant 14 : i32
    %100 = tpu.dynamic_rotate %96 by %c14_i32 dim 0 : vector<16x128xf32>, i32 -> vector<16x128xf32>
    %101 = arith.select %99, %96, %100 : vector<16x128xi1>, vector<16x128xf32>
    %c0_56 = arith.constant 0 : index
    %c0_57 = arith.constant 0 : index
    %102 = vector.load %arg7[%c0_56, %c0_57] : memref<4x16xf32, #tpu.memory_space<vmem>>, vector<4x16xf32>
    %cst_58 = arith.constant dense<0.000000e+00> : vector<4x128xf32>
    %103 = tpu.matmul %102, %101, %cst_58 {dimension_numbers = #tpu.dot_dimension_numbers<[1], [0], [0], [1], [0, 0, 1, 1], [], []>, precision = #tpu.contract_precision<fp32>} : vector<4x16xf32>, vector<16x128xf32>, vector<4x128xf32> -> vector<4x128xf32>
    %c0_59 = arith.constant 0 : index
    %c0_60 = arith.constant 0 : index
    %c0_61 = arith.constant 0 : index
    %104 = vector.load %arg8[%c0_59, %c0_60, %c0_61] : memref<1x4x128xf32, #tpu.memory_space<vmem>>, vector<1x4x128xf32>
    %105 = vector.shape_cast %104 : vector<1x4x128xf32> to vector<4x128xf32>
    %106 = vector.shape_cast %103 : vector<4x128xf32> to vector<1x4x128xf32>
    tpu.vector_store %arg8[%c0_59, %c0_60, %c0_61], %106 {strides = array<i32>} : memref<1x4x128xf32, #tpu.memory_space<vmem>>, vector<1x4x128xf32>,
    return
  }
  func.func @transform_0(%arg0: i32) -> (i32, i32, i32) {
    %c0_i32 = arith.constant 0 : i32
    %c0_i32_0 = arith.constant 0 : i32
    %c0_i32_1 = arith.constant 0 : i32
    return %arg0, %c0_i32, %c0_i32_0 : i32, i32, i32
  }
  func.func @transform_1(%arg0: i32) -> (i32, i32, i32) {
    %c0_i32 = arith.constant 0 : i32
    %c0_i32_0 = arith.constant 0 : i32
    %c0_i32_1 = arith.constant 0 : i32
    %c0_i32_2 = arith.constant 0 : i32
    return %c0_i32, %c0_i32_0, %c0_i32_1 : i32, i32, i32
  }
  func.func @transform_2(%arg0: i32) -> (i32, i32) {
    %c0_i32 = arith.constant 0 : i32
    %c0_i32_0 = arith.constant 0 : i32
    %c0_i32_1 = arith.constant 0 : i32
    return %c0_i32, %c0_i32_0 : i32, i32
  }
  func.func @transform_3(%arg0: i32) -> (i32, i32, i32) {
    %c0_i32 = arith.constant 0 : i32
    %c0_i32_0 = arith.constant 0 : i32
    %c0_i32_1 = arith.constant 0 : i32
    %c0_i32_2 = arith.constant 0 : i32
    return %c0_i32, %c0_i32_0, %c0_i32_1 : i32, i32, i32
  }
  func.func @transform_4(%arg0: i32) -> (i32, i32) {
    %c0_i32 = arith.constant 0 : i32
    %c0_i32_0 = arith.constant 0 : i32
    %c0_i32_1 = arith.constant 0 : i32
    return %c0_i32, %c0_i32_0 : i32, i32
  }
  func.func @transform_5(%arg0: i32) -> (i32, i32) {
    %c0_i32 = arith.constant 0 : i32
    %c0_i32_0 = arith.constant 0 : i32
    %c0_i32_1 = arith.constant 0 : i32
    return %c0_i32, %c0_i32_0 : i32, i32
  }
  func.func @transform_6(%arg0: i32) -> (i32, i32) {
    %c0_i32 = arith.constant 0 : i32
    %c0_i32_0 = arith.constant 0 : i32
    %c0_i32_1 = arith.constant 0 : i32
    return %c0_i32, %c0_i32_0 : i32, i32
  }
  func.func @transform_7(%arg0: i32) -> (i32, i32, i32) {
    %c0_i32 = arith.constant 0 : i32
    %c0_i32_0 = arith.constant 0 : i32
    %c0_i32_1 = arith.constant 0 : i32
    return %arg0, %c0_i32, %c0_i32_0 : i32, i32, i32
  }
  func.func @transform_8(%arg0: i32) -> (i32, i32, i32) {
    %c0_i32 = arith.constant 0 : i32
    %c0_i32_0 = arith.constant 0 : i32
    %c0_i32_1 = arith.constant 0 : i32
    return %arg0, %c0_i32, %c0_i32_0 : i32, i32, i32
  }
}

</mosaic_0001>

<bundles_post_ra>
// kernel: tpu_custom_call.1
= control target key start
LH: loop header
LB: loop body
LE: loop exit
PB: predicated region body
PF: predicated region fallthrough
CT: control target
= control target key end

     0   :  { %s2444_s0 = inlined_call_operand.hbm [shape: f32[2,16,64], index: 0, kind: input, shape index: {}]   ;;  %s2445_s1 = inlined_call_operand.hbm [shape: f32[3,64,128], index: 1, kind: input, shape index: {}]   ;;  %s2446_s2 = inlined_call_operand.vmem [shape: f32[1,128], index: 2, kind: input, shape index: {}]   ;;  %s2447_s3 = inlined_call_operand.hbm [shape: f32[3,128,128], index: 3, kind: input, shape index: {}]   ;;  %s2448_s4 = inlined_call_operand.hbm [shape: f32[1,128], index: 4, kind: input, shape index: {}]   ;;  %s2449_s5 = inlined_call_operand.hbm [shape: f32[128,128], index: 5, kind: input, shape index: {}]   ;;  %s2450_s6 = inlined_call_operand.vmem [shape: f32[4,16], index: 6, kind: input, shape index: {}]   ;;  %s2451_s7 = inlined_call_operand.hbm [shape: f32[2,4,128], index: 7, kind: output, shape index: {0}]   ;;  %s2452_s8 = inlined_call_operand.hbm [shape: f32[2,16,128], index: 8, kind: output, shape index: {1}]  }
   0x1   :  { %2455 = sst [smem:[#allocation19_spill]] %s2445_s1 }
   0x2   :  { %2456 = sst [smem:[#allocation20_spill]] %s2447_s3 }
   0x3   :  { %14 = vsyncpa [#allocation3], 0 }
   0x4   :  { %16 = vsyncpa [#allocation3 + $0x1], 0 }
   0x5   :  { %17 = vsyncpa [#allocation6], 0 }
   0x6   :  { %18 = vsyncpa [#allocation9], 0 }
   0x7   :  { %19 = vsyncpa [#allocation4], 0 }
   0x8   :  { %21 = vsyncpa [#allocation4 + $0x1], 0 }
   0x9   :  { %22 = vsyncpa [#allocation13], 0 }
   0xa   :  { %24 = vsyncpa [#allocation13 + $0x1], 0  ;;  %s1917_s27 = smov 0   ;;  %s1919_s28 = smov 0  }
   0xb   :  { %s1921_s29 = smov 0   ;;  %s1923_s30 = smov 0  }
   0xc LB: > { %s1938_s9 = sadd.s32 4294967295, %s1861_s30   ;;  %s1469_s10 = sadd.s32 4294967294, %s1861_s30   ;;  %s1861_s30 = sphi %s1923_s30, %s2475_s30   ;;  %s1857_s29 = sphi %s1921_s29, %s2474_s29   ;;  %s1853_s28 = sphi %s1919_s28, %s2473_s28   ;;  %s1849_s27 = sphi %s1917_s27, %s2472_s27  }
   0xd   : > { %p50_p0 = scmp.ne.s32.totalorder %s1853_s28, %s1849_s27  ;;  %p51_p1 = scmp.eq.s32.totalorder %s1938_s9, 0 }
   0xe   : > { %p200_p2 = scmp.eq.s32.totalorder %s1938_s9, 1  ;;  %p206_p3 = scmp.eq.s32.totalorder %s1469_s10, 1 }
   0xf   : > { %p1947_p4 = por %p51_p1, %p50_p0  ;;  %p1470_p5 = scmp.ge.s32.totalorder %s1861_s30, 1 }
  0x10   : > { %p1952_p6 = por %p206_p3, %p50_p0  ;;  %p239_p7 = scmp.lt.s32.totalorder %s1861_s30, 3 }
  0x11   : > { %s2459_s1 = sld [smem:[#allocation19_spill]]  ;;  %s1863_s17 = smov [#allocation5]  }
  0x12   : > { %p1960_p8 = pnand %p1470_p5, %p239_p7  ;;  %s252_s18 = sshll.u32 %s1863_s17, 4  ;;  %s253_s18 = int_to_ptr.vmem [resolvable:$true] %s252_s18 }
  0x13   : > { %s282_s22 = sshll.u32 %s2448_s4, 4  ;;  %s2453_s23 = smov 128   ;;  %s283_s22 = int_to_ptr.hbm [resolvable:$true] %s282_s22 }
  0x14   : > { %p1528_p9 = pneg %p1960_p8  ;;  %s2454_s24 = smov 8  }
  0x15   : > { %s1866_s25 = smov [#allocation8]   ;;  %s2462_s3 = sld [smem:[#allocation20_spill]] }
  0x16   : > { %p1968_p10 = pnand %p1528_p9, %p51_p1  ;;  %s284_s26 = sshll.u32 %s1866_s25, 4  ;;  %s285_s26 = int_to_ptr.vmem [resolvable:$true] %s284_s26 }
  0x17   : > { %s250_s15 = sshll.u32 %s2459_s1, 4  ;;  %s1868_s25 = smov [#allocation10]   ;;  %s251_s15 = int_to_ptr.hbm [resolvable:$true] %s250_s15 }
  0x18   : > { %1531 = dma.hbm_to_vmem [thread:$0]  (!%p1968_p10), %s251_s15, 3072, %s253_s18, [#allocation6], %s2453_s23, %s2453_s23, %s2454_s24  }
  0x19   : > { %1537 = dma.hbm_to_vmem [thread:$0]  (!%p1968_p10), %s283_s22, 16, %s285_s26, [#allocation9]  }
  0x1a   : > { %s293_s15 = sshll.u32 %s2449_s5, 4  ;;  %s1867_s18 = smov [#allocation7]   ;;  %s294_s15 = int_to_ptr.hbm [resolvable:$true] %s293_s15 }
  0x1b   : > { %s267_s14 = sshll.u32 %s2462_s3, 4  ;;  %s269_s21 = sshll.u32 %s1867_s18, 4  ;;  %s268_s14 = int_to_ptr.hbm [resolvable:$true] %s267_s14  ;;  %s270_s21 = int_to_ptr.vmem [resolvable:$true] %s269_s21 }
  0x1c   : > { %1534 = dma.hbm_to_vmem [thread:$0]  (!%p1968_p10), %s268_s14, 6144, %s270_s21, [#allocation6], %s2453_s23, %s2453_s23, %s2454_s24  }
  0x1d   : > { %s295_s22 = sshll.u32 %s1868_s25, 4  ;;  %s2000_s26 = sadd.s32 1, %s1861_s30   ;;  %s296_s22 = int_to_ptr.vmem [resolvable:$true] %s295_s22 }
  0x1e   : > { %1540 = dma.hbm_to_vmem [thread:$0]  (!%p1968_p10), %s294_s15, 2048, %s296_s22, [#allocation9], %s2453_s23, %s2453_s23, %s2454_s24  }
  0x1f   : > { %s37_s10 = sadd.s32 1, %s1857_s29  ;;  %s34_s13 = ssub.s32 %s1861_s30, %s2000_s26 }
  0x20   : > { %p44_p12 = scmp.ne.s32.totalorder %s1857_s29, %s1853_s28  ;;  %p35_p13 = scmp.eq.s32.totalorder %s34_s13, 0 }
  0x21   : > { %p45_p0 = scmp.eq.s32.totalorder %s1861_s30, 0  ;;  %p1556_p5 = scmp.lt.s32.totalorder %s1861_s30, 2 }
  0x22   : > { %p2010_p3 = por %p200_p2, %p44_p12  ;;  %s312_s19 = sand.u32 1, %s1857_s29  }
  0x23   : > { %s2016_s17 = scalar_select %p35_p13, %s1857_s29, %s37_s10  }
  0x24   : > { %p46_p7 = por %p45_p0, %p44_p12  ;;  %s1476_s20 = sshll.u32 %s312_s19, 4 }
  0x25   : > { %s1504_s15 = sshll.u32 %s1861_s30, 4  ;;  %s316_s22 = scalar_lea.vmem [#allocation2], %s1476_s20 }
  0x26   : > { %s321_s25 = scalar_lea.hbm %s2444_s0, %s1504_s15  ;;  %s324_s23 = sshll.u32 %s316_s22, 4  ;;  %s325_s23 = int_to_ptr.vmem [resolvable:$true] %s324_s23 }
  0x27   : > { %s322_s13 = sshll.u32 %s321_s25, 4  ;;  %p2023_p2 = pnand %p1556_p5, %p46_p7  ;;  %s323_s13 = int_to_ptr.hbm [resolvable:$true] %s322_s13 }
  0x28   : > { %s313_s10 = scalar_lea.sflag [#allocation3], %s312_s19  ;;  %s1725_s1 = sshra.s32 %s323_s13, 4  ;;  %s1726_s1 = int_to_ptr.hbm [resolvable:$true] %s1725_s1 }
  0x29   : > { %s1727_s3 = scalar_lea.hbm %s1726_s1, 16  ;;  %p1729_p10 = pneg %p2023_p2 }
  0x2a   : > { %p1728_p9 = scmp.ne.s32.totalorder %s1726_s1, %s1727_s3  ;;  %s1732_s18 = scalar_lea.hbm %s2444_s0, 32 }
  0x2b   : > { %p1733_p0 = scmp.lt.s32.totalorder %s1726_s1, %s2444_s0  ;;  %p1734_p5 = scmp.lt.s32.totalorder %s1732_s18, %s1727_s3 }
  0x2c   : > { %p1730_p12 = pnand %p1729_p10, %p1728_p9 }
  0x2d   : > { %p1735_p7 = por %p1734_p5, %p1733_p0 }
  0x2e   : > { %p1731_p13 = pneg %p1730_p12 }
  0x30   : > { %p1736_p11 = pnand %p1735_p7, %p1731_p13 }
  0x32   : > { %1739 = shalt.err (!%p1736_p11)
}
  0x33   : > { %s2465_s19 = smov 8   ;;  %s2466_s22 = smov 128  }
  0x34   : > { %1544 = dma.hbm_to_vmem [thread:$0]  (!%p2023_p2), %s323_s13, 256, %s325_s23, %s313_s10, %s2466_s22, %s2466_s22, %s2465_s19  }
  0x35   : > { %336 = sbr.rel (%p1960_p8) target bundleno = 820 (0x334), region = 48  ;;  %s2043_s15 = sand.u32 (!%p1960_p8), 1, %s1853_s28  }
  0x36   : > { %s1480_s1 = sshll.u32 (!%p1960_p8), %s2043_s15, 4  ;;  %s339_s3 = scalar_lea.sflag (!%p1960_p8), [#allocation3], %s2043_s15 }
  0x37   : > { %s2049_s20 = scalar_lea.vmem (!%p1960_p8), [#allocation2], %s1480_s1 }
  0x3a   : > { %1828 = dma.done.wait (%p1947_p4), %s339_s3, 256  }
  0x3b   : > { %1830 = vsyncadd (%p1947_p4), %s339_s3, 4294967040 }
  0x3c   : > { %1832 = dma.done.wait (%p51_p1), [#allocation6], 9216  }
  0x3d   : > { %1834 = vsyncadd (%p51_p1), [#allocation6], 4294958080 }
  0x3e   : > { %1836 = dma.done.wait (%p51_p1), [#allocation9], 2064  }
  0x3f   : > { %1838 = vsyncadd (%p51_p1), [#allocation9], 4294965232  ;;  %v430_v0 = vld [vmem:[#allocation5 + $0xb8] sm:$0xff]  ;;  %v429_v1 = vld [vmem:[#allocation5 + $0xb0] sm:$0xff]  ;;  %v431_v5 = vlaneseq  ;;  %vm476_vm3 = vcmask 523264   ;;  %s2198_s23 = scalar_lea.vmem [#allocation12], %s1480_s1 }
  0x40   : > { %v421_v2 = vld [vmem:[#allocation5 + $0x78] sm:$0xff]  ;;  %549 = vmatpush.msra.mxu2 %v430_v0  ;;  %v420_v4 = vld [vmem:[#allocation5 + $0x70] sm:$0xff]  ;;  %v428_v6 = vld [vmem:[#allocation5 + $0xa8] sm:$0xff]  ;;  %s1869_s24 = smov 120   ;;  %vm1126_vm7 = vcmask 130048   ;;  %s1322_s18 = sshll.u32 %s2198_s23, 4  ;;  %s1323_s18 = int_to_ptr.vmem [resolvable:$true] %s1322_s18 }
  0x41   : > { %491 = vmatpush.msra.mxu0 %v421_v2  ;;  %v412_v3 = vld [vmem:[#allocation5 + $0x38] sm:$0xff]  ;;  %v411_v7 = vld [vmem:[#allocation5 + $0x30] sm:$0xff]  ;;  %v419_v8 = vld [vmem:[#allocation5 + $0x68] sm:$0xff]  ;;  %v2064_v13 = vshrl.u32 %v431_v5, 7  ;;  %s1505_s21 = sshll.u32 %s1938_s9, 4  ;;  %s1296_s3 = scalar_lea.sflag [#allocation13], %s2043_s15 }
  0x42   : > { %520 = vmatpush.msra.mxu1 %v412_v3  ;;  %550 = vmatpush.msra.mxu2 %v429_v1  ;;  %v410_v9 = vld [vmem:[#allocation5 + $0x28] sm:$0xff]  ;;  %v427_v10 = vld [vmem:[#allocation5 + $0xa0] sm:$0xff]  ;;  %v426_v14 = vld [vmem:[#allocation5 + $0x98] sm:$0xff]  ;;  %s1321_s22 = scalar_lea.hbm %s2452_s8, %s1505_s21 }
  0x43   : > { %492 = vmatpush.msra.mxu0 %v420_v4  ;;  %v418_v11 = vld [vmem:[#allocation5 + $0x60] sm:$0xff]  ;;  %v417_v15 = vld [vmem:[#allocation5 + $0x58] sm:$0xff]  ;;  %v438_v19 = vand.u32 15, %v2064_v13  ;;  %v425_v21 = vld [vmem:[#allocation5 + $0x90] sm:$0xff]  ;;  %vm462_vm0 = vcmp.lt.s32.totalorder %v2064_v13, 1  ;;  %vm471_vm1 = vcmp.lt.s32.totalorder %v2064_v13, 7 }
  0x44   : > { %521 = vmatpush.msra.mxu1 %v411_v7  ;;  %551 = vmatpush.msra.mxu2 %v428_v6  ;;  %v409_v12 = vld [vmem:[#allocation5 + $0x20] sm:$0xff]  ;;  %v408_v17 = vld [vmem:[#allocation5 + $0x18] sm:$0xff]  ;;  %v416_v22 = vld [vmem:[#allocation5 + $0x50] sm:$0xff]  ;;  %v433_v30 = vadd.s32 8, %v2064_v13  ;;  %vm1120_vm8 = vcmp.lt.s32.totalorder %v2064_v13, 6  ;;  %s1324_s1 = sshll.u32 %s1321_s22, 4  ;;  %s1325_s1 = int_to_ptr.hbm [resolvable:$true] %s1324_s1 }
  0x45   : > { %493 = vmatpush.msra.mxu0 %v419_v8  ;;  %v2067_v16 = vld [vmem:[%s2049_s20] sm:$0xff]  ;;  %v2070_v18 = vld [vmem:[%s2049_s20 + $0x8] sm:$0xff]  ;;  %vm2080_vm2 = vcmp.eq.s32.totalorder %v438_v19, 0  ;;  %s1769_s20 = sshra.s32 %s1325_s1, 4  ;;  %s1770_s20 = int_to_ptr.hbm [resolvable:$true] %s1769_s20 }
  0x46   : > { %522 = vmatpush.msra.mxu1 %v410_v9  ;;  %552 = vmatpush.msra.mxu2 %v427_v10  ;;  %v460_v20 = vrot.slane %v2067_v16, 7  ;;  %v461_v23 = vrot.slane %v2070_v18, 7  ;;  %v407_v24 = vld [vmem:[#allocation5 + $0x10] sm:$0xff]  ;;  %v469_v25 = vrot.slane %v2067_v16, 1  ;;  %v470_v26 = vrot.slane %v2070_v18, 1  ;;  %v605_v27 = vld [vmem:[#allocation7 + $0xf8] sm:$0xff]  ;;  %vm1493_vm5 = vmneg %vm2080_vm2  ;;  %p1776_p11 = scmp.lt.s32.totalorder %s1770_s20, %s2452_s8 }
  0x47   : > { %494 = vmatpush.msra.mxu0 %v418_v11  ;;  %v424_v28 = vld [vmem:[#allocation5 + $0x88] sm:$0xff]  ;;  %v604_v34 = vld [vmem:[#allocation7 + $0xf0] sm:$0xff]  ;;  %v423_v35 = vld [vmem:[#allocation5 + $0x80] sm:$0xff]  ;;  %635 = vmatpush.msra.mxu3 %v605_v27  ;;  %v445_v40 = vand.u32 15, %v433_v30  ;;  %s1771_s11 = scalar_lea.hbm %s1770_s20, 16 }
  0x48   : > { %523 = vmatpush.msra.mxu1 %v409_v12  ;;  %553 = vmatpush.msra.mxu2 %v426_v14  ;;  %v415_v29 = vld [vmem:[#allocation5 + $0x48] sm:$0xff]  ;;  %v464_v33 = vsel %vm462_vm0, %v461_v23, %v460_v20  ;;  %v414_v36 = vld [vmem:[#allocation5 + $0x40] sm:$0xff]  ;;  %v472_v37 = vsel %vm471_vm1, %v469_v25, %v470_v26  ;;  %v588_v42 = vld [vmem:[#allocation7 + $0x78] sm:$0xff]  ;;  %v473_v47 = vsel %vm471_vm1, %v470_v26, %v469_v25  ;;  %p1772_p1 = scmp.ne.s32.totalorder %s1770_s20, %s1771_s11 }
  0x49   : > { %495 = vmatpush.msra.mxu0 %v417_v15  ;;  %v406_v31 = vld [vmem:[#allocation5 + $0x8] sm:$0xff]  ;;  %v405_v38 = vld [vmem:[#allocation5] sm:$0xff]  ;;  %v465_v39 = vsel %vm2080_vm2, 0.0, %v464_v33  ;;  %636 = vmatpush.msra.mxu3 %v604_v34  ;;  %v622_v43 = vld [vmem:[#allocation7 + $0x178] sm:$0xff]  ;;  %vm2094_vm4 = vcmp.eq.s32.totalorder %v445_v40, 15  ;;  %v463_v54 = vsel %vm462_vm0, %v460_v20, %v461_v23 }
  0x4a   : > { %524 = vmatpush.msra.mxu1 %v408_v17  ;;  %554 = vmatpush.msra.mxu2 %v425_v21  ;;  %v603_v41 = vld [vmem:[#allocation7 + $0xe8] sm:$0xff]  ;;  %v602_v44 = vld [vmem:[#allocation7 + $0xe0] sm:$0xff]  ;;  %v587_v45 = vld [vmem:[#allocation7 + $0x70] sm:$0xff]  ;;  %v475_v52 = vsel %vm2094_vm4, 0.0, %v473_v47  ;;  %p1773_p4 = pnand %p1772_p1, %p2010_p3 }
  0x4b   : > { %496 = vmatpush.msra.mxu0 %v416_v22  ;;  %637 = vmatpush.msra.mxu3 %v603_v41  ;;  %v621_v48 = vld [vmem:[#allocation7 + $0x170] sm:$0xff]  ;;  %v601_v49 = vld [vmem:[#allocation7 + $0xd8] sm:$0xff]  ;;  %v586_v50 = vld [vmem:[#allocation7 + $0x68] sm:$0xff] }
  0x4c   : > { %525 = vmatpush.msra.mxu1 %v407_v24  ;;  %555 = vmatpush.msra.mxu2 %v424_v28  ;;  %v620_v51 = vld [vmem:[#allocation7 + $0x168] sm:$0xff]  ;;  %v600_v53 = vld [vmem:[#allocation7 + $0xd0] sm:$0xff]  ;;  %v585_v56 = vld [vmem:[#allocation7 + $0x60] sm:$0xff]  ;;  %p1774_p8 = pneg %p1773_p4 }
  0x4d   : > { %497 = vmatpush.msra.mxu0 %v415_v29  ;;  %638 = vmatpush.msra.mxu3 %v602_v44  ;;  %v599_v55 = vld [vmem:[#allocation7 + $0xc8] sm:$0xff]  ;;  %v619_v57 = vld [vmem:[#allocation7 + $0x160] sm:$0xff]  ;;  %v584_v59 = vld [vmem:[#allocation7 + $0x58] sm:$0xff] }
  0x4e   : > { %526 = vmatpush.msra.mxu1 %v406_v31  ;;  %556 = vmatpush.msra.mxu2 %v423_v35  ;;  %v598_v58 = vld [vmem:[#allocation7 + $0xc0] sm:$0xff]  ;;  %v618_v60 = vld [vmem:[#allocation7 + $0x158] sm:$0xff]  ;;  %v583_v62 = vld [vmem:[#allocation7 + $0x50] sm:$0xff] }
  0x4f   : > { %498 = vmatpush.msra.mxu0 %v414_v36  ;;  %1491 = vmatmul.msk.f32.vlgmr.msra.gmra.mxu2 %vm476_vm3, %v472_v37  ;;  %v597_v61 = vld [vmem:[#allocation7 + $0xb8] sm:$0xff]  ;;  %v617_v63 = vld [vmem:[#allocation7 + $0x150] sm:$0xff]  ;;  %v595_v1 = vld [vmem:[#allocation7 + $0xa8] sm:$0xff] }
  0x50   : > { %527 = vmatpush.msra.mxu1 %v405_v38  ;;  %1487 = vmatmul.msk.f32.vlgmr.msra.gmra.mxu0 %vm476_vm3, %v2067_v16  ;;  %v596_v0 = vld [vmem:[#allocation7 + $0xb0] sm:$0xff]  ;;  %v594_v2 = vld [vmem:[#allocation7 + $0xa0] sm:$0xff]  ;;  %v582_v3 = vld [vmem:[#allocation7 + $0x48] sm:$0xff] }
  0x51   : > { %1489 = vmatmul.msk.f32.vlgmr.msra.gmra.mxu1 %vm476_vm3, %v465_v39  ;;  %658 = vmatpush.msrb.mxu0 %v588_v42  ;;  %v616_v4 = vld [vmem:[#allocation7 + $0x148] sm:$0xff]  ;;  %v593_v6 = vld [vmem:[#allocation7 + $0x98] sm:$0xff]  ;;  %v581_v7 = vld [vmem:[#allocation7 + $0x40] sm:$0xff] }
  0x52   : > { %681 = vmatpush.msrb.mxu1 %v622_v43  ;;  %639 = vmatpush.msra.mxu3 %v601_v49  ;;  %v615_v8 = vld [vmem:[#allocation7 + $0x140] sm:$0xff]  ;;  %v592_v9 = vld [vmem:[#allocation7 + $0x90] sm:$0xff]  ;;  %v580_v10 = vld [vmem:[#allocation7 + $0x38] sm:$0xff] }
  0x53   : > { %659 = vmatpush.msrb.mxu0 %v587_v45  ;;  %v614_v11 = vld [vmem:[#allocation7 + $0x138] sm:$0xff]  ;;  %v591_v12 = vld [vmem:[#allocation7 + $0x88] sm:$0xff]  ;;  %v579_v14 = vld [vmem:[#allocation7 + $0x30] sm:$0xff] }
  0x54   : > { %682 = vmatpush.msrb.mxu1 %v621_v48  ;;  %640 = vmatpush.msra.mxu3 %v600_v53  ;;  %v613_v15 = vld [vmem:[#allocation7 + $0x130] sm:$0xff]  ;;  %v590_v16 = vld [vmem:[#allocation7 + $0x80] sm:$0xff]  ;;  %v578_v17 = vld [vmem:[#allocation7 + $0x28] sm:$0xff] }
  0x55   : > { %660 = vmatpush.msrb.mxu0 %v586_v50  ;;  %v577_v19 = vld [vmem:[#allocation7 + $0x20] sm:$0xff]  ;;  %v576_v21 = vld [vmem:[#allocation7 + $0x18] sm:$0xff]  ;;  %v575_v23 = vld [vmem:[#allocation7 + $0x10] sm:$0xff] }
  0x56   : > { %683 = vmatpush.msrb.mxu1 %v620_v51  ;;  %641 = vmatpush.msra.mxu3 %v599_v55  ;;  %v611_v20 = vld [vmem:[#allocation7 + $0x120] sm:$0xff]  ;;  %v610_v22 = vld [vmem:[#allocation7 + $0x118] sm:$0xff]  ;;  %v609_v24 = vld [vmem:[#allocation7 + $0x110] sm:$0xff] }
  0x57   : > { %1492 = vmatmul.msk.f32.gmra.mxu2 %vm476_vm3, %v475_v52  ;;  %661 = vmatpush.msrb.mxu0 %v585_v56  ;;  %v574_v25 = vld [vmem:[#allocation7 + $0x8] sm:$0xff]  ;;  %v573_v27 = vld [vmem:[#allocation7] sm:$0xff]  ;;  %vm1495_vm6 = vmneg %vm2094_vm4 }
  0x58   : > { %1488 = vmatmul.msk.f32.gmra.mxu0 %vm476_vm3, %v2070_v18  ;;  %684 = vmatpush.msrb.mxu1 %v619_v57  ;;  %v612_v18 = vld [vmem:[#allocation7 + $0x128] sm:$0xff]  ;;  %v607_v28 = vld [vmem:[#allocation7 + $0x100] sm:$0xff]  ;;  %v741_v55 = vld [vmem:[#allocation10 + $0x70] sm:$0xff] }
  0x59   : > { %1490 = vmatmul.msk.f32.gmra.mxu1 %vm476_vm3, %v463_v54  ;;  %642 = vmatpush.msra.mxu3 %v598_v58  ;;  %v608_v26 = vld [vmem:[#allocation7 + $0x108] sm:$0xff]  ;;  %v1603_v33 = vld [vmem:[%s2446_s2] ss:$0 sm:$0xff]  ;;  %v2125_v58 = vand.u32 4294901760, %v741_v55 }
  0x5a   : > { %662 = vmatpush.msrb.mxu0 %v584_v59  ;;  %685 = vmatpush.msrb.mxu1 %v618_v60  ;;  %v742_v54 = vld [vmem:[#allocation10 + $0x78] sm:$0xff]  ;;  %v740_v56 = vld [vmem:[#allocation10 + $0x68] sm:$0xff]  ;;  %v739_v46 = vld [vmem:[#allocation10 + $0x60] sm:$0xff] }
  0x5b   : > { %643 = vmatpush.msra.mxu3 %v597_v61  ;;  %v2123_v57 = vand.u32 4294901760, %v742_v54  ;;  %v2127_v59 = vand.u32 4294901760, %v740_v56  ;;  %v738_v60 = vld [vmem:[#allocation10 + $0x58] sm:$0xff]  ;;  %v737_v61 = vld [vmem:[#allocation10 + $0x50] sm:$0xff] }
  0x5c   : > { %663 = vmatpush.msrb.mxu0 %v583_v62  ;;  %686 = vmatpush.msrb.mxu1 %v617_v63 }
  0x5d   : > { %644 = vmatpush.msra.mxu3 %v596_v0  ;;  %v2129_v0 = vand.u32 4294901760, %v739_v46  ;;  %744 = vmatpush.msrb.mxu2 %v2123_v57 }
  0x5e   : > { %664 = vmatpush.msrb.mxu0 %v582_v3  ;;  %687 = vmatpush.msrb.mxu1 %v616_v4  ;;  %v736_v3 = vld [vmem:[#allocation10 + $0x48] sm:$0xff] }
  0x5f   : > { %645 = vmatpush.msra.mxu3 %v595_v1  ;;  %v2131_v1 = vand.u32 4294901760, %v738_v60  ;;  %746 = vmatpush.msrb.mxu2 %v2125_v58 }
  0x60   : > { %665 = vmatpush.msrb.mxu0 %v581_v7  ;;  %688 = vmatpush.msrb.mxu1 %v615_v8  ;;  %v2138_v7 = vsub.f32 %v742_v54, %v2123_v57  ;;  %v2141_v8 = vsub.f32 %v741_v55, %v2125_v58  ;;  %v729_v55 = vld [vmem:[#allocation10 + $0x10] sm:$0xff] }
  0x61   : > { %646 = vmatpush.msra.mxu3 %v594_v2  ;;  %v2133_v2 = vand.u32 4294901760, %v737_v61  ;;  %748 = vmatpush.msrb.mxu2 %v2127_v59 }
  0x62   : > { %666 = vmatpush.msrb.mxu0 %v580_v10  ;;  %689 = vmatpush.msrb.mxu1 %v614_v11  ;;  %v2148_v10 = vsub.f32 %v739_v46, %v2129_v0  ;;  %v2151_v11 = vsub.f32 %v738_v60, %v2131_v1 }
  0x63   : > { %647 = vmatpush.msra.mxu3 %v593_v6  ;;  %v2135_v6 = vld [vmem:[#allocation8] ss:$0 sm:$0xff]  ;;  %750 = vmatpush.msrb.mxu2 %v2129_v0 }
  0x64   : > { %667 = vmatpush.msrb.mxu0 %v579_v14  ;;  %690 = vmatpush.msrb.mxu1 %v613_v15  ;;  %v2156_v14 = vand.u32 4294901760, %v736_v3 }
  0x65   : > { %648 = vmatpush.msra.mxu3 %v592_v9  ;;  %v2144_v9 = vsub.f32 %v740_v56, %v2127_v59  ;;  %752 = vmatpush.msrb.mxu2 %v2131_v1 }
  0x66   : > { %668 = vmatpush.msrb.mxu0 %v578_v17  ;;  %691 = vmatpush.msrb.mxu1 %v612_v18  ;;  %v800_v17 = vand.u32 4294901760, %v2141_v8 }
  0x67   : > { %649 = vmatpush.msra.mxu3 %v591_v12  ;;  %v2154_v12 = vsub.f32 %v737_v61, %v2133_v2  ;;  %v806_v18 = vand.u32 4294901760, %v2144_v9  ;;  %754 = vmatpush.msrb.mxu2 %v2133_v2 }
  0x68   : > { %669 = vmatpush.msrb.mxu0 %v577_v19  ;;  %692 = vmatpush.msrb.mxu1 %v611_v20  ;;  %v812_v19 = vand.u32 4294901760, %v2148_v10  ;;  %v818_v20 = vand.u32 4294901760, %v2151_v11 }
  0x69   : > { %650 = vmatpush.msra.mxu3 %v590_v16  ;;  %v794_v16 = vand.u32 4294901760, %v2138_v7  ;;  %756 = vmatpush.msrb.mxu2 %v2156_v14 }
  0x6a   : > { %670 = vmatpush.msrb.mxu0 %v576_v21  ;;  %693 = vmatpush.msrb.mxu1 %v610_v22  ;;  %v2167_v21 = vsub.f32 %v736_v3, %v2156_v14 }
  0x6c   : > { %671 = vmatpush.msrb.mxu0 %v575_v23  ;;  %694 = vmatpush.msrb.mxu1 %v609_v24  ;;  %v795_v23 = vsub.f32 %v2138_v7, %v794_v16  ;;  %v801_v24 = vsub.f32 %v2141_v8, %v800_v17 }
  0x6e   : > { %672 = vmatpush.msrb.mxu0 %v574_v25  ;;  %695 = vmatpush.msrb.mxu1 %v608_v26  ;;  %v807_v25 = vsub.f32 %v2144_v9, %v806_v18  ;;  %v824_v26 = vand.u32 4294901760, %v2154_v12 }
  0x70   : > { %673 = vmatpush.msrb.mxu0 %v573_v27  ;;  %696 = vmatpush.msrb.mxu1 %v607_v28  ;;  %v735_v27 = vld [vmem:[#allocation10 + $0x40] sm:$0xff]  ;;  %v734_v28 = vld [vmem:[#allocation10 + $0x38] sm:$0xff] }
  0x72   : > { %957 = vmatpush.msra.mxu1 %v2123_v57  ;;  %899 = vmatpush.msra.mxu0 %v2138_v7 }
  0x74   : > { %959 = vmatpush.msra.mxu1 %v2125_v58  ;;  %902 = vmatpush.msra.mxu0 %v2141_v8 }
  0x76   : > { %961 = vmatpush.msra.mxu1 %v2127_v59  ;;  %905 = vmatpush.msra.mxu0 %v2144_v9 }
  0x78   : > { %963 = vmatpush.msra.mxu1 %v2129_v0  ;;  %908 = vmatpush.msra.mxu0 %v2148_v10 }
  0x7a   : > { %965 = vmatpush.msra.mxu1 %v2131_v1  ;;  %911 = vmatpush.msra.mxu0 %v2151_v11 }
  0x7c   : > { %967 = vmatpush.msra.mxu1 %v2133_v2  ;;  %914 = vmatpush.msra.mxu0 %v2154_v12 }
  0x7e   : > { %969 = vmatpush.msra.mxu1 %v2156_v14  ;;  %917 = vmatpush.msra.mxu0 %v2167_v21 }
  0xcd   : > { %v500_v29 = vpop.f32.mrf.mxu0 }
  0xce   : > { %v529_v30 = vpop.f32.mrf.mxu1 }
  0xcf   : > { %v530_v31 = vadd.f32 %v529_v30, %v500_v29  ;;  %v796_v30 = vand.u32 4294901760, %v795_v23 }
  0xd1   : > { %797 = vmatpush.msrb.mxu3 %v796_v30  ;;  %v728_v30 = vld [vmem:[#allocation10 + $0x8] sm:$0xff] }
  0xd2   : > { %v558_v34 = vpop.f32.mrf.mxu2 }
  0xd3   : > { %v564_v35 = vadd.f32 %v558_v34, %v530_v31  ;;  %v802_v31 = vand.u32 4294901760, %v801_v24  ;;  %v733_v34 = vld [vmem:[#allocation10 + $0x30] sm:$0xff] }
  0xd5   : > { %v569_v36 = vadd.f32 %v1603_v33, %v564_v35  ;;  %v503_v37 = vpop.f32.mrf.mxu0  ;;  %v732_v35 = vld [vmem:[#allocation10 + $0x28] sm:$0xff]  ;;  %803 = vmatpush.msrb.mxu3 %v802_v31 }
  0xd6   : > { %v532_v38 = vpop.f32.mrf.mxu1 }
  0xd7   : > { %v571_v39 = vmax.f32 %v569_v36, 0.0  ;;  %v533_v40 = vadd.f32 %v532_v38, %v503_v37  ;;  %v731_v36 = vld [vmem:[#allocation10 + $0x20] sm:$0xff] }
  0xd9   : > { %651 = vmatmul.f32.vlgmr.msra.gmra.mxu3 %v571_v39  ;;  %v623_v45 = vrot.slane %v571_v39, 7  ;;  %v629_v48 = vrot.slane %v571_v39, 1  ;;  %v819_v39 = vsub.f32 %v2151_v11, %v818_v20 }
  0xda   : > { %v561_v41 = vpop.f32.mrf.mxu2 }
  0xdb   : > { %v565_v42 = vadd.f32 %v561_v41, %v533_v40  ;;  %v830_v40 = vand.u32 4294901760, %v2167_v21  ;;  %v820_v56 = vand.u32 4294901760, %v819_v39 }
  0xdd   : > { %v570_v43 = vadd.f32 %v1603_v33, %v565_v42  ;;  %v813_v33 = vsub.f32 %v2148_v10, %v812_v19  ;;  %v808_v42 = vand.u32 4294901760, %v807_v25  ;;  %v831_v46 = vsub.f32 %v2167_v21, %v830_v40 }
  0xdf   : > { %v572_v44 = vmax.f32 %v570_v43, 0.0  ;;  %v2202_v43 = vand.u32 4294901760, %v735_v27  ;;  %809 = vmatpush.msrb.mxu3 %v808_v42 }
  0xe1   : > { %v624_v47 = vrot.slane %v572_v44, 7  ;;  %654 = vmatmul.f32.gmra.mxu3 %v572_v44  ;;  %v630_v49 = vrot.slane %v572_v44, 1  ;;  %v2205_v44 = vand.u32 4294901760, %v734_v28  ;;  %758 = vmatpush.msrb.mxu2 %v2202_v43 }
  0xe2   : > { %971 = vmatpush.msra.mxu1 %v2202_v43 }
  0xe3   : > { %v626_v50 = vsel %vm462_vm0, %v624_v47, %v623_v45  ;;  %v631_v51 = vsel %vm471_vm1, %v629_v48, %v630_v49  ;;  %v625_v52 = vsel %vm462_vm0, %v623_v45, %v624_v47  ;;  %v632_v32 = vsel %vm471_vm1, %v630_v49, %v629_v48  ;;  %v730_v45 = vld [vmem:[#allocation10 + $0x18] sm:$0xff]  ;;  %760 = vmatpush.msrb.mxu2 %v2205_v44 }
  0xe4   : > { %1494 = vmatmul.msk.f32.vlgmr.msrb.gmra.mxu0 %vm1493_vm5, %v626_v50  ;;  %697 = vmatmul.f32.vlgmr.msrb.gmra.mxu1 %v631_v51  ;;  %v825_v48 = vsub.f32 %v2154_v12, %v824_v26  ;;  %v2210_v49 = vand.u32 4294901760, %v733_v34  ;;  %v2212_v50 = vand.u32 4294901760, %v732_v35  ;;  %v2214_v51 = vand.u32 4294901760, %v731_v36 }
  0xe5   : > { %v2222_v54 = vsub.f32 %v734_v28, %v2205_v44  ;;  %v2231_v61 = vand.u32 4294901760, %v730_v45  ;;  %v832_v28 = vand.u32 4294901760, %v831_v46  ;;  %973 = vmatpush.msra.mxu1 %v2205_v44 }
  0xe6   : > { %v2229_v60 = vsub.f32 %v733_v34, %v2210_v49  ;;  %v826_v23 = vand.u32 4294901760, %v825_v48  ;;  %762 = vmatpush.msrb.mxu2 %v2210_v49 }
  0xe7   : > { %v842_v3 = vand.u32 4294901760, %v2222_v54  ;;  %975 = vmatpush.msra.mxu1 %v2210_v49 }
  0xe8   : > { %v848_v25 = vand.u32 4294901760, %v2229_v60  ;;  %764 = vmatpush.msrb.mxu2 %v2212_v50 }
  0xe9   : > { %977 = vmatpush.msra.mxu1 %v2212_v50 }
  0xea   : > { %v849_v42 = vsub.f32 %v2229_v60, %v848_v25  ;;  %766 = vmatpush.msrb.mxu2 %v2214_v51 }
  0xeb   : > { %979 = vmatpush.msra.mxu1 %v2214_v51 }
  0xec   : > { %677 = vmatmul.f32.gmra.mxu0 %v625_v52  ;;  %1496 = vmatmul.msk.f32.gmra.mxu1 %vm1495_vm6, %v632_v32  ;;  %v814_v32 = vand.u32 4294901760, %v813_v33  ;;  %v843_v33 = vsub.f32 %v2222_v54, %v842_v3 }
  0xed   : > { %768 = vmatpush.msrb.mxu2 %v2231_v61  ;;  %981 = vmatpush.msra.mxu1 %v2231_v61 }
  0xee   : > { %815 = vmatpush.msrb.mxu3 %v814_v32 }
  0xf0   : > { %821 = vmatpush.msrb.mxu3 %v820_v56 }
  0xf2   : > { %827 = vmatpush.msrb.mxu3 %v826_v23 }
  0xf4   : > { %833 = vmatpush.msrb.mxu3 %v832_v28 }
 0x15c   : > { %v652_v53 = vpop.f32.mrf.mxu3 }
 0x161   : > { %v675_v62 = vpop.f32.mrf.mxu0  ;;  %v698_v63 = vpop.f32.mrf.mxu1 }
 0x162   : > { %v676_v4 = vadd.f32 %v675_v62, %v652_v53  ;;  %v2219_v53 = vsub.f32 %v735_v27, %v2202_v43 }
 0x164   : > { %v704_v15 = vadd.f32 %v698_v63, %v676_v4  ;;  %v655_v37 = vpop.f32.mrf.mxu3  ;;  %v836_v63 = vand.u32 4294901760, %v2219_v53  ;;  %v2240_v4 = vsub.f32 %v732_v35, %v2212_v50  ;;  %v2268_v35 = vsub.f32 %v730_v45, %v2231_v61  ;;  %920 = vmatpush.msra.mxu0 %v2219_v53 }
 0x165   : > { %v2282_v45 = vand.u32 4294901760, %v728_v30 }
 0x166   : > { %v709_v22 = vadd.f32 %v2135_v6, %v704_v15  ;;  %v2243_v15 = vsub.f32 %v731_v36, %v2214_v51  ;;  %v837_v24 = vsub.f32 %v2219_v53, %v836_v63  ;;  %v854_v34 = vand.u32 4294901760, %v2240_v4  ;;  %v727_v36 = vld [vmem:[#allocation10] sm:$0xff]  ;;  %923 = vmatpush.msra.mxu0 %v2222_v54 }
 0x167   : > { %v2287_v48 = vand.u32 4294901760, %v727_v36  ;;  %v2297_v56 = vsub.f32 %v728_v30, %v2282_v45 }
 0x168   : > { %v2184_v29 = vmax.f32 %v709_v22, 0.0  ;;  %v2245_v22 = vand.u32 4294901760, %v729_v55  ;;  %v855_v32 = vsub.f32 %v2240_v4, %v854_v34  ;;  %926 = vmatpush.msra.mxu0 %v2229_v60 }
 0x169   : > { %v678_v38 = vpop.f32.mrf.mxu0  ;;  %v701_v47 = vpop.f32.mrf.mxu1  ;;  %v2308_v23 = vsub.f32 %v727_v36, %v2287_v48 }
 0x16a   : > { %713 = vst [vmem:[%s2198_s23] sm:$0xff] %v2184_v29  ;;  %v679_v41 = vadd.f32 %v678_v38, %v655_v37  ;;  %v715_v27 = vrot.slane %v2184_v29, 1  ;;  %v860_v37 = vand.u32 4294901760, %v2243_v15  ;;  %v2272_v38 = vsub.f32 %v729_v55, %v2245_v22  ;;  %929 = vmatpush.msra.mxu0 %v2240_v4  ;;  %770 = vmatpush.msrb.mxu2 %v2245_v22 }
 0x16b   : > { %v866_v55 = vand.u32 4294901760, %v2268_v35  ;;  %v856_v28 = vand.u32 4294901760, %v855_v32  ;;  %983 = vmatpush.msra.mxu1 %v2245_v22 }
 0x16c   : > { %v705_v52 = vadd.f32 %v701_v47, %v679_v41  ;;  %v838_v41 = vand.u32 4294901760, %v837_v24  ;;  %v861_v46 = vsub.f32 %v2243_v15, %v860_v37  ;;  %932 = vmatpush.msra.mxu0 %v2243_v15  ;;  %772 = vmatpush.msrb.mxu2 %v2282_v45 }
 0x16d   : > { %v867_v30 = vsub.f32 %v2268_v35, %v866_v55  ;;  %985 = vmatpush.msra.mxu1 %v2282_v45 }
 0x16e   : > { %v710_v62 = vadd.f32 %v2135_v6, %v705_v52  ;;  %v844_v52 = vand.u32 4294901760, %v843_v33  ;;  %839 = vmatpush.msrb.mxu3 %v838_v41  ;;  %v878_v33 = vand.u32 4294901760, %v2297_v56  ;;  %v862_v36 = vand.u32 4294901760, %v861_v46  ;;  %935 = vmatpush.msra.mxu0 %v2268_v35 }
 0x16f   : > { %v868_v41 = vand.u32 4294901760, %v867_v30  ;;  %774 = vmatpush.msrb.mxu2 %v2287_v48  ;;  %987 = vmatpush.msra.mxu1 %v2287_v48 }
 0x170   : > { %v2249_v6 = vmax.f32 %v710_v62, 0.0  ;;  %v872_v62 = vand.u32 4294901760, %v2272_v38  ;;  %845 = vmatpush.msrb.mxu3 %v844_v52  ;;  %938 = vmatpush.msra.mxu0 %v2272_v38 }
 0x171   : > { %1004 = vmatpush.msra.mxu2 %v794_v16 }
 0x172   : > { %714 = vst [vmem:[%s2198_s23 + $0x8] sm:$0xff] %v2249_v6  ;;  %v716_v31 = vrot.slane %v2249_v6, 1  ;;  %941 = vmatpush.msra.mxu0 %v2297_v56  ;;  %s1775_s23 = scalar_lea.hbm %s2452_s8, 32 }
 0x173   : > { %1008 = vmatpush.msra.mxu2 %v800_v17  ;;  %p1777_p2 = scmp.lt.s32.totalorder %s1775_s23, %s1771_s11 }
 0x174   : > { %v717_v39 = vsel %vm471_vm1, %v715_v27, %v716_v31  ;;  %v718_v24 = vsel %vm471_vm1, %v716_v31, %v715_v27  ;;  %v873_v27 = vsub.f32 %v2272_v38, %v872_v62  ;;  %v884_v31 = vand.u32 4294901760, %v2308_v23  ;;  %944 = vmatpush.msra.mxu0 %v2308_v23 }
 0x175   : > { %v2285_v47 = vmax.f32 %v2184_v29, %v717_v39  ;;  %v850_v29 = vand.u32 4294901760, %v849_v42  ;;  %v2327_v39 = vmax.f32 %v2249_v6, %v718_v24  ;;  %v879_v42 = vsub.f32 %v2297_v56, %v878_v33  ;;  %1012 = vmatpush.msra.mxu2 %v806_v18  ;;  %p1778_p9 = por %p1777_p2, %p1776_p11 }
 0x176   : > { %v874_v52 = vand.u32 4294901760, %v873_v27  ;;  %v885_v6 = vsub.f32 %v2308_v23, %v884_v31 }
 0x177   : > { %721 = vrot.lane.b32.xlu0 %v2285_v47, %s1869_s24  ;;  %851 = vmatpush.msrb.mxu3 %v850_v29  ;;  %v880_v32 = vand.u32 4294901760, %v879_v42  ;;  %p1779_p10 = pnand %p1778_p9, %p1774_p8 }
 0x178   : > { %v886_v29 = vand.u32 4294901760, %v885_v6  ;;  %1016 = vmatpush.msra.mxu2 %v812_v19 }
 0x179   : > { %857 = vmatpush.msrb.mxu3 %v856_v28 }
 0x17a   : > { %1020 = vmatpush.msra.mxu2 %v818_v20 }
 0x17b   : > { %863 = vmatpush.msrb.mxu3 %v862_v36 }
 0x17c   : > { %1024 = vmatpush.msra.mxu2 %v824_v26 }
 0x17d   : > { %869 = vmatpush.msrb.mxu3 %v868_v41 }
 0x17e   : > { %1028 = vmatpush.msra.mxu2 %v830_v40 }
 0x17f   : > { %723 = vrot.lane.b32.xlu0 %v2327_v39, %s1869_s24  ;;  %875 = vmatpush.msrb.mxu3 %v874_v52 }
 0x180   : > { %1032 = vmatpush.msra.mxu2 %v836_v63 }
 0x181   : > { %881 = vmatpush.msrb.mxu3 %v880_v32 }
 0x182   : > { %1036 = vmatpush.msra.mxu2 %v842_v3 }
 0x183   : > { %887 = vmatpush.msrb.mxu3 %v886_v29 }
 0x184   : > { %1040 = vmatpush.msra.mxu2 %v848_v25 }
 0x185   : > { %1075 = vmatpush.msra.mxu3 %v2123_v57 }
 0x186   : > { %1044 = vmatpush.msra.mxu2 %v854_v34 }
 0x187   : > { %1077 = vmatpush.msra.mxu3 %v2125_v58 }
 0x188   : > { %1048 = vmatpush.msra.mxu2 %v860_v37  ;;  %v1116_v37 = vand.u32 127, %v431_v5 }
 0x189   : > { %1079 = vmatpush.msra.mxu3 %v2127_v59 }
 0x18a   : > { %1052 = vmatpush.msra.mxu2 %v866_v55  ;;  %vm1117_vm9 = vcmp.lt.s32.totalorder %v1116_v37, 64 }
 0x18b   : > { %1081 = vmatpush.msra.mxu3 %v2129_v0 }
 0x18c   : > { %1056 = vmatpush.msra.mxu2 %v872_v62 }
 0x18d   : > { %1083 = vmatpush.msra.mxu3 %v2131_v1 }
 0x18e   : > { %1060 = vmatpush.msra.mxu2 %v878_v33 }
 0x18f   : > { %1085 = vmatpush.msra.mxu3 %v2133_v2 }
 0x190   : > { %1064 = vmatpush.msra.mxu2 %v884_v31 }
 0x191   : > { %1087 = vmatpush.msra.mxu3 %v2156_v14 }
 0x193   : > { %1089 = vmatpush.msra.mxu3 %v2202_v43  ;;  %v1125_v43 = vld [vmem:[%s2450_s6] sm:$0xf] }
 0x194   : > { %v1128_v53 = vsel %vm1126_vm7, %v1125_v43, 0 }
 0x195   : > { %1091 = vmatpush.msra.mxu3 %v2205_v44  ;;  %v1148_v63 = vand.u32 4294901760, %v1128_v53 }
 0x197   : > { %1093 = vmatpush.msra.mxu3 %v2210_v49 }
 0x199   : > { %1095 = vmatpush.msra.mxu3 %v2212_v50 }
 0x19b   : > { %1097 = vmatpush.msra.mxu3 %v2214_v51 }
 0x19d   : > { %1099 = vmatpush.msra.mxu3 %v2231_v61 }
 0x19f   : > { %1101 = vmatpush.msra.mxu3 %v2245_v22  ;;  %v1149_v22 = vsub.f32 %v1128_v53, %v1148_v63 }
 0x1a1   : > { %1103 = vmatpush.msra.mxu3 %v2282_v45 }
 0x1a3   : > { %1105 = vmatpush.msra.mxu3 %v2287_v48 }
 0x1e9   : > { %v722_v57 = vpop.permute.xlu0 %721 }
 0x1ea   : > { %v725_v58 = vmax.f32 %v2285_v47, %v722_v57  ;;  %v1150_v47 = vand.u32 4294901760, %v1149_v22 }
 0x1ec   : > { %v775_v59 = vand.u32 4294901760, %v725_v58  ;;  %v1151_v62 = vsub.f32 %v1149_v22, %v1150_v47 }
 0x1ee   : > { %v776_v0 = vsub.f32 %v725_v58, %v775_v59  ;;  %889 = vmatmul.f32.vlgmr.msrb.gmra.mxu3 %v775_v59  ;;  %v1152_v27 = vand.u32 4294901760, %v1151_v62 }
 0x1f0   : > { %v777_v1 = vand.u32 4294901760, %v776_v0  ;;  %947 = vmatmul.f32.vlgmr.msra.gmra.mxu0 %v776_v0 }
 0x1f1   : > { %v724_v2 = vpop.permute.xlu0 %723 }
 0x1f2   : > { %v726_v7 = vmax.f32 %v2327_v39, %v724_v2  ;;  %991 = vmatmul.f32.vlgmr.msra.gmra.mxu1 %v777_v1  ;;  %v778_v8 = vsub.f32 %v776_v0, %v777_v1 }
 0x1f4   : > { %v783_v9 = vand.u32 4294901760, %v726_v7  ;;  %v779_v10 = vand.u32 4294901760, %v778_v8 }
 0x1f6   : > { %v784_v11 = vsub.f32 %v726_v7, %v783_v9  ;;  %780 = vmatmul.f32.vlgmr.msrb.gmra.mxu2 %v779_v10  ;;  %893 = vmatmul.f32.gmra.mxu3 %v783_v9 }
 0x1f8   : > { %952 = vmatmul.f32.gmra.mxu0 %v784_v11  ;;  %v785_v12 = vand.u32 4294901760, %v784_v11 }
 0x1fa   : > { %997 = vmatmul.f32.gmra.mxu1 %v785_v12  ;;  %v786_v14 = vsub.f32 %v784_v11, %v785_v12 }
 0x1fc   : > { %v787_v16 = vand.u32 4294901760, %v786_v14 }
 0x1fe   : > { %788 = vmatmul.f32.gmra.mxu2 %v787_v16  ;;  %1107 = vmatmul.f32.vlgmr.msra.gmra.mxu3 %v775_v59 }
 0x206   : > { %1066 = vmatmul.f32.vlgmr.msra.gmra.mxu2 %v775_v59  ;;  %1111 = vmatmul.f32.gmra.mxu3 %v783_v9 }
 0x20e   : > { %1070 = vmatmul.f32.gmra.mxu2 %v783_v9 }
 0x26d   : > { %v948_v20 = vpop.f32.mrf.mxu0 }
 0x26f   : > { %v992_v40 = vpop.f32.mrf.mxu1 }
 0x271   : > { %v890_v17 = vpop.f32.mrf.mxu3 }
 0x275   : > { %v953_v54 = vpop.f32.mrf.mxu0 }
 0x277   : > { %v998_v4 = vpop.f32.mrf.mxu1 }
 0x279   : > { %v781_v18 = vpop.f32.mrf.mxu2  ;;  %v894_v19 = vpop.f32.mrf.mxu3 }
 0x27a   : > { %v891_v26 = vadd.f32 %v890_v17, %v781_v18 }
 0x27c   : > { %v949_v44 = vadd.f32 %v948_v20, %v891_v26 }
 0x27e   : > { %v993_v61 = vadd.f32 %v992_v40, %v949_v44 }
 0x281   : > { %v789_v21 = vpop.f32.mrf.mxu2  ;;  %v1108_v50 = vpop.f32.mrf.mxu3 }
 0x282   : > { %v895_v49 = vadd.f32 %v894_v19, %v789_v21 }
 0x284   : > { %v954_v60 = vadd.f32 %v953_v54, %v895_v49 }
 0x286   : > { %v999_v15 = vadd.f32 %v998_v4, %v954_v60 }
 0x289   : > { %v1067_v51 = vpop.f32.mrf.mxu2  ;;  %v1112_v38 = vpop.f32.mrf.mxu3 }
 0x28a   : > { %v1068_v3 = vadd.f32 %v1067_v51, %v993_v61 }
 0x28c   : > { %v1109_v34 = vadd.f32 %v1108_v50, %v1068_v3 }
 0x28e   : > { %v1118_v48 = vrot.slane %v1109_v34, 2 }
 0x291   : > { %v1071_v25 = vpop.f32.mrf.mxu2 }
 0x292   : > { %v1072_v35 = vadd.f32 %v1071_v25, %v999_v15 }
 0x294   : > { %v1113_v45 = vadd.f32 %v1112_v38, %v1072_v35 }
 0x296   : > { %v1119_v55 = vrot.slane %v1113_v45, 2 }
 0x298   : > { %v1121_v56 = vsel %vm1120_vm8, %v1118_v48, %v1119_v55  ;;  %v1122_v46 = vsel %vm1120_vm8, %v1119_v55, %v1118_v48 }
 0x299   : > { %v1124_v23 = vsel %vm1117_vm9, %v1113_v45, %v1122_v46  ;;  %v1123_v24 = vsel %vm1117_vm9, %v1109_v34, %v1121_v56 }
 0x29a   : > { %v1144_v28 = vand.u32 4294901760, %v1124_v23  ;;  %v1146_v30 = vand.u32 4294901760, %v1123_v24 }
 0x29c   : > { %1145 = vmatpush.msrb.mxu0 %v1144_v28  ;;  %v1172_v33 = vsub.f32 %v1124_v23, %v1144_v28  ;;  %v1178_v36 = vsub.f32 %v1123_v24, %v1146_v30 }
 0x29e   : > { %1147 = vmatpush.msrb.mxu0 %v1146_v30  ;;  %1204 = vmatpush.msrb.mxu2 %v1172_v33  ;;  %v1173_v5 = vand.u32 4294901760, %v1172_v33  ;;  %v1179_v31 = vand.u32 4294901760, %v1178_v36 }
 0x29f   : > { %1153 = vmatmul.f32.vlgmr.msrb.gmra.mxu0 %v1152_v27 }
 0x2a0   : > { %1229 = vmatpush.msra.mxu0 %v1144_v28  ;;  %1207 = vmatpush.msrb.mxu2 %v1178_v36  ;;  %v1174_v13 = vsub.f32 %v1172_v33, %v1173_v5  ;;  %v1180_v39 = vsub.f32 %v1178_v36, %v1179_v31 }
 0x2a1   : > { %1210 = vmatmul.f32.vlgmr.msrb.gmra.mxu2 %v1149_v22 }
 0x2a2   : > { %1231 = vmatpush.msra.mxu0 %v1146_v30  ;;  %1281 = vmatpush.msra.mxu2 %v1144_v28  ;;  %v1175_v41 = vand.u32 4294901760, %v1174_v13  ;;  %v1181_v42 = vand.u32 4294901760, %v1180_v39 }
 0x2a4   : > { %1283 = vmatpush.msra.mxu2 %v1146_v30  ;;  %1176 = vmatpush.msrb.mxu1 %v1175_v41 }
 0x2a6   : > { %1182 = vmatpush.msrb.mxu1 %v1181_v42 }
 0x2a7   : > { %1184 = vmatmul.f32.vlgmr.msrb.gmra.mxu1 %v1148_v63  ;;  %1235 = vmatmul.f32.vlgmr.msra.gmra.mxu0 %v1150_v47 }
 0x2a8   : > { %1256 = vmatpush.msra.mxu1 %v1173_v5 }
 0x2a9   : > { %1285 = vmatmul.f32.vlgmr.msra.gmra.mxu2 %v1148_v63 }
 0x2aa   : > { %1260 = vmatpush.msra.mxu1 %v1179_v31 }
 0x2af   : > { %1262 = vmatmul.f32.vlgmr.msra.gmra.mxu1 %v1148_v63 }
 0x2b0   : > { %1782 = shalt.err (!%p1779_p10)
}
 0x2b1   : > { %s1870_s21 = smov 128   ;;  %s1871_s25 = smov 8  }
 0x2b2   : > { %1525 = dma.vmem_to_hbm [thread:$0]  (%p2010_p3), %s1323_s18, 256, %s1325_s1, %s1296_s3, %s1870_s21, %s1870_s21, %s1871_s25  }
 0x2b3   : > { %s1485_s19 = sshll.u32 %s2043_s15, 2  ;;  %s1499_s22 = sshll.u32 %s1938_s9, 2 }
 0x2b4   : > { %s1306_s16 = scalar_lea.hbm %s2451_s7, %s1499_s22  ;;  %s393_s24 = scalar_lea.vmem [#allocation11], %s1485_s19 }
 0x2b5   : > { %s1308_s23 = sshll.u32 %s393_s24, 4  ;;  %s1310_s18 = sshll.u32 %s1306_s16, 4  ;;  %s1309_s23 = int_to_ptr.vmem [resolvable:$true] %s1308_s23  ;;  %s1311_s18 = int_to_ptr.hbm [resolvable:$true] %s1310_s18 }
 0x2b6   : > { %s1291_s1 = scalar_lea.sflag [#allocation4], %s2043_s15  ;;  %s1797_s9 = sshra.s32 %s1311_s18, 4  ;;  %s1798_s9 = int_to_ptr.hbm [resolvable:$true] %s1797_s9 }
 0x2b7   : > { %s1799_s3 = scalar_lea.hbm %s1798_s9, 4  ;;  %s1803_s21 = scalar_lea.hbm %s2451_s7, 8 }
 0x2b8   : > { %p1800_p12 = scmp.ne.s32.totalorder %s1798_s9, %s1799_s3  ;;  %p1804_p5 = scmp.lt.s32.totalorder %s1798_s9, %s2451_s7 }
 0x2b9   : > { %p1805_p7 = scmp.lt.s32.totalorder %s1803_s21, %s1799_s3 }
 0x2ba   : > { %p1801_p13 = pnand %p1800_p12, %p2010_p3 }
 0x2bb   : > { %p1806_p1 = por %p1805_p7, %p1804_p5 }
 0x2bc   : > { %p1802_p0 = pneg %p1801_p13 }
 0x2be   : > { %p1807_p4 = pnand %p1806_p1, %p1802_p0 }
 0x31c   : > { %v1154_v52 = vpop.f32.mrf.mxu0 }
 0x324   : > { %v1185_v6 = vpop.f32.mrf.mxu1  ;;  %v1211_v32 = vpop.f32.mrf.mxu2 }
 0x325   : > { %v1186_v29 = vadd.f32 %v1185_v6, %v1154_v52  ;;  %v1236_v58 = vpop.f32.mrf.mxu0 }
 0x327   : > { %v1212_v57 = vadd.f32 %v1211_v32, %v1186_v29 }
 0x329   : > { %v1237_v59 = vadd.f32 %v1236_v58, %v1212_v57 }
 0x32c   : > { %v1263_v0 = vpop.f32.mrf.mxu1  ;;  %v1286_v1 = vpop.f32.mrf.mxu2 }
 0x32d   : > { %v1264_v2 = vadd.f32 %v1263_v0, %v1237_v59 }
 0x32f   : > { %v1287_v7 = vadd.f32 %v1286_v1, %v1264_v2 }
 0x331   : > { %1289 = vst [vmem:[%s393_s24] sm:$0xf] %v1287_v7 }
 0x332   : > { %1810 = shalt.err (!%p1807_p4)
}
 0x333   : > { %1524 = dma.vmem_to_hbm [thread:$0]  (%p2010_p3), %s1309_s23, 64, %s1311_s18, %s1291_s1  }
 0x334 PF: > { %s1339_s15 = sand.u32 1, %s1849_s27   ;;  %p2471_p8 = scmp.ge.s32.totalorder %s1861_s30, 2 }
 0x335   : > { %s1340_s22 = scalar_lea.sflag [#allocation4], %s1339_s15 }
 0x336   : > { %p1546_p11 = pnand %p2471_p8, %p1952_p6 }
 0x338   : > { %p1547_p2 = pneg %p1546_p11 }
 0x33a   : > { %1840 = dma.done.wait (%p1547_p2), %s1340_s22, 64  }
 0x33b   : > { %1842 = vsyncadd (%p1547_p2), %s1340_s22, 4294967232  ;;  %s1350_s20 = scalar_lea.sflag [#allocation13], %s1339_s15 }
 0x33c   : > { %1844 = dma.done.wait (%p1547_p2), %s1350_s20, 256  }
 0x33d   : > { %1846 = vsyncadd (%p1547_p2), %s1350_s20, 4294967040  ;;  %p27_p3 = scmp.ge.s32.totalorder %s2000_s26, 4   ;;  %s2472_s27 = smov %s1853_s28 }
 0x33e   : > { %s2473_s28 = smov %s1857_s29  ;;  %s2474_s29 = smov %s2016_s17 }
 0x33f   : > { %s2475_s30 = smov %s2000_s26  ;;  %29 = sbr.rel (!%p27_p3) target bundleno = 12 (0xc), region = 130 }
 0x344   :  { %1356 = vsyncpa [#allocation3], 1 }
 0x345   :  { %1358 = vsyncpa [#allocation3 + $0x1], 1 }
 0x346   :  { %1359 = vsyncpa [#allocation6], 1 }
 0x347   :  { %1360 = vsyncpa [#allocation9], 1 }
 0x348   :  { %1361 = vsyncpa [#allocation4], 1 }
 0x349   :  { %1363 = vsyncpa [#allocation4 + $0x1], 1 }
 0x34a   :  { %1364 = vsyncpa [#allocation13], 1 }
 0x34b   :  { %1366 = vsyncpa [#allocation13 + $0x1], 1 }

</bundles_post_ra>
